<compile_context>
chip_gen: v7x
topology: tpu7x:2x2x1
jax: 0.10.0
libtpu: 0.0.40
codegen_flags: <defaults>
</compile_context>

<pallas_src>
import functools

import numpy as np

import jax
import jax.numpy as jnp
from jax.experimental import pallas as pl
from jax.experimental.pallas import tpu as pltpu


def _round_up(x, m):
    return ((x + m - 1) // m) * m


# ----------------------------------------------------------------------------- #
# Pallas kernels
# ----------------------------------------------------------------------------- #
def _mel_l1_kernel(fr_ref, frh_ref, basis_ref, melw_ref, out_ref, *, kp):
    """Fused STFT + mel + log + L1 partial-sum over one tile of frames.

    fr_ref/frh_ref : [TILE_N, W]  bf16 frames (waveform / waveform_hat)
    basis_ref      : [W, 2*kp]    bf16, [cos*win | -sin*win], zero lane padding
    melw_ref       : [kp, MP]     f32 mel filterbank (zero padded rows/cols)
    out_ref        : [1, 1, MP]   f32 per-tile lane-wise partial sum of |diff|
    """
    basis = basis_ref[...]
    melw = melw_ref[...]

    def log_mel(frames):
        d = jnp.dot(frames, basis, preferred_element_type=jnp.float32)   # [N, 2kp]
        re = d[:, :kp]
        im = d[:, kp:]
        mag = jnp.sqrt(jnp.maximum(re * re + im * im, 1e-8))             # |STFT|
        mel = jnp.dot(mag, melw, preferred_element_type=jnp.float32)     # [N, MP]
        return jnp.log(jnp.maximum(mel, 1e-5))                           # amp_to_db

    diff = jnp.abs(log_mel(fr_ref[...]) - log_mel(frh_ref[...]))         # [N, MP]
    out_ref[...] = jnp.sum(diff, axis=0, keepdims=True)[None]            # [1,1,MP]


def _kl_partial_kernel(z_p_ref, logs_q_ref, m_p_ref, logs_p_ref, mask_ref,
                       num_ref, den_ref):
    """Per-time-tile partial KL numerator / denominator (lane-dense outputs)."""
    z_p = z_p_ref[...]
    logs_q = logs_q_ref[...]
    m_p = m_p_ref[...]
    logs_p = logs_p_ref[...]
    mask = mask_ref[...]                              # [B, 1, TILE_T]
    kl = logs_p - logs_q - 0.5
    kl = kl + 0.5 * jnp.square(z_p - m_p) * jnp.exp(-2.0 * logs_p)
    kl = kl * mask                                    # broadcast over C
    num_ref[...] = jnp.sum(kl, axis=(0, 1), keepdims=True)    # [1,1,TILE_T]
    den_ref[...] = jnp.sum(mask, axis=(0, 1), keepdims=True)  # [1,1,TILE_T]


# ----------------------------------------------------------------------------- #
# Deterministic parameter construction (synthetic "init", no checkpoint)
# ----------------------------------------------------------------------------- #
def _mel_filterbank(n_mels, n_fft, sample_rate, fmin, fmax):
    # TODO(synk): simple HTK-style triangular filters; librosa's slaney-normalized
    # mel basis (used by Coqui TorchSTFT) is not reproduced bit-exactly.
    def hz_to_mel(f):
        return 2595.0 * np.log10(1.0 + f / 700.0)

    def mel_to_hz(m):
        return 700.0 * (10.0 ** (m / 2595.0) - 1.0)

    n_bins = n_fft // 2 + 1
    mels = np.linspace(hz_to_mel(fmin), hz_to_mel(fmax), n_mels + 2)
    hz = mel_to_hz(mels)
    freqs = np.linspace(0.0, sample_rate / 2.0, n_bins)
    fb = np.zeros((n_mels, n_bins), dtype=np.float32)
    for m in range(1, n_mels + 1):
        f_l, f_c, f_r = hz[m - 1], hz[m], hz[m + 1]
        left = (freqs - f_l) / max(f_c - f_l, 1e-8)
        right = (f_r - freqs) / max(f_r - f_c, 1e-8)
        fb[m - 1] = np.maximum(0.0, np.minimum(left, right))
    return fb


# ----------------------------------------------------------------------------- #
# Small scalar losses: plain jnp on purpose (fused by XLA under jit).
# ----------------------------------------------------------------------------- #
def _feature_loss(feats_a, feats_b):
    loss = jnp.float32(0.0)
    for dr, dg in zip(feats_a, feats_b):
        for rl, gl in zip(dr, dg):
            rl = jax.lax.stop_gradient(rl.astype(jnp.float32))   # mirrors .detach()
            gl = gl.astype(jnp.float32)
            loss = loss + jnp.mean(jnp.abs(rl - gl))
    return loss * 2.0


def _generator_loss(scores_fake):
    loss = jnp.float32(0.0)
    for dg in scores_fake:
        d = 1.0 - dg.astype(jnp.float32)
        loss = loss + jnp.mean(d * d)
    return loss


def _cosine_similarity_loss(a, b):
    a = a.astype(jnp.float32)
    b = b.astype(jnp.float32)
    na = jnp.maximum(jnp.sqrt(jnp.sum(a * a, axis=-1)), 1e-8)
    nb = jnp.maximum(jnp.sqrt(jnp.sum(b * b, axis=-1)), 1e-8)
    cos = jnp.sum(a * b, axis=-1) / (na * nb)
    return -jnp.mean(cos)


# ----------------------------------------------------------------------------- #
# Module
# ----------------------------------------------------------------------------- #
class VitsGeneratorLossPallas:
    def __init__(
        self,
        fft_size=64,
        hop_length=16,
        win_length=64,
        sample_rate=16000,
        mel_fmin=0.0,
        mel_fmax=8000.0,
        num_mels=10,
        kl_loss_alpha=1.0,
        gen_loss_alpha=1.0,
        feat_loss_alpha=1.0,
        dur_loss_alpha=1.0,
        mel_loss_alpha=45.0,
        speaker_encoder_loss_alpha=1.0,
    ):
        assert win_length == fft_size, "this synthetic kernel assumes win_length == n_fft"
        assert fft_size % hop_length == 0, "hop-aligned framing assumes n_fft % hop == 0"
        self.fft_size = fft_size
        self.hop_length = hop_length
        self.num_mels = num_mels
        self.kl_loss_alpha = kl_loss_alpha
        self.gen_loss_alpha = gen_loss_alpha
        self.feat_loss_alpha = feat_loss_alpha
        self.dur_loss_alpha = dur_loss_alpha
        self.mel_loss_alpha = mel_loss_alpha
        self.spk_encoder_loss_alpha = speaker_encoder_loss_alpha

        n_bins = fft_size // 2 + 1
        self.kp = _round_up(n_bins, 128)        # lane-padded #freq bins
        self.mp = _round_up(num_mels, 128)      # lane-padded #mel bins

        # hann window (torch.hann_window, periodic) folded into the DFT bases,
        # cos and -sin concatenated into one lane-padded [W, 2*Kp] bf16 matrix.
        n = np.arange(win_length)
        window = 0.5 - 0.5 * np.cos(2.0 * np.pi * n / win_length)
        k = np.arange(n_bins)
        ang = 2.0 * np.pi * np.outer(n, k) / fft_size
        basis = np.zeros((win_length, 2 * self.kp), dtype=np.float32)
        basis[:, :n_bins] = np.cos(ang) * window[:, None]
        basis[:, self.kp:self.kp + n_bins] = -np.sin(ang) * window[:, None]
        self.basis = jnp.asarray(basis, dtype=jnp.bfloat16)

        mel_fb = _mel_filterbank(num_mels, fft_size, sample_rate, mel_fmin, mel_fmax)
        mel_w = np.zeros((self.kp, self.mp), dtype=np.float32)
        mel_w[:n_bins, :num_mels] = mel_fb.T
        self.mel_w = jnp.asarray(mel_w)         # f32: keeps log near 1e-5 clip precise

    # --- framing: reflect pad + hop-aligned slices (no gather), bf16 frames --- #
    def _frame(self, waveform):
        B = waveform.shape[0]
        pad = (self.fft_size - self.hop_length) // 2
        x = jnp.pad(
            waveform.astype(jnp.float32), ((0, 0), (0, 0), (pad, pad)), mode="reflect"
        )[:, 0, :]
        t_padded = x.shape[-1]
        hop = self.hop_length
        n_frames = 1 + (t_padded - self.fft_size) // hop
        r = self.fft_size // hop                       # hops per frame
        n_hops = n_frames - 1 + r
        xh = x[:, : n_hops * hop].reshape(B, n_hops, hop)
        # frame i = concat_s xh[:, i+s, :]   (contiguous slices, no gather)
        frames = jnp.concatenate([xh[:, s:s + n_frames, :] for s in range(r)], axis=-1)
        frames = frames.reshape(B * n_frames, self.fft_size).astype(jnp.bfloat16)
        return frames, n_frames

    # --- fused STFT + mel + log + L1 sum (both waveforms, one kernel) --------- #
    def _mel_l1_mean(self, waveform, waveform_hat):
        frames, n_frames = self._frame(waveform)
        frames_hat, _ = self._frame(waveform_hat)
        N, W = frames.shape

        # Keep the tile's VMEM working set modest even for large n_fft (v7x has
        # 32 MiB scoped VMEM, v5e defaults to 16 MiB).
        tile_cap = 512 if self.fft_size <= 256 else 256
        tile_n = min(tile_cap, _round_up(N, 8))
        n_pad = _round_up(N, tile_n)
        if n_pad != N:   # zero frames are identical for both inputs -> 0 L1 contribution
            frames = jnp.pad(frames, ((0, n_pad - N), (0, 0)))
            frames_hat = jnp.pad(frames_hat, ((0, n_pad - N), (0, 0)))
        n_tiles = n_pad // tile_n

        kernel = functools.partial(_mel_l1_kernel, kp=self.kp)
        partials = pl.pallas_call(
            kernel,
            out_shape=jax.ShapeDtypeStruct((n_tiles, 1, self.mp), jnp.float32),
            grid=(n_tiles,),
            in_specs=[
                pl.BlockSpec((tile_n, W), lambda i: (i, 0)),
                pl.BlockSpec((tile_n, W), lambda i: (i, 0)),
                pl.BlockSpec((W, 2 * self.kp), lambda i: (0, 0)),   # resident basis
                pl.BlockSpec((self.kp, self.mp), lambda i: (0, 0)),  # resident mel fb
            ],
            out_specs=pl.BlockSpec((1, 1, self.mp), lambda i: (i, 0, 0)),
            compiler_params=pltpu.CompilerParams(dimension_semantics=("parallel",)),
        )(frames, frames_hat, self.basis, self.mel_w)

        n_elems = N * self.num_mels          # real elements of torch's l1 mean
        return jnp.sum(partials) / jnp.float32(n_elems)

    # --- KL term, tiled over time, lane-dense per-tile partials --------------- #
    def _kl_loss(self, z_p, logs_q, m_p, logs_p, z_mask):
        B, C, T = z_p.shape
        if T >= 512:
            tile_t = 512
        elif T >= 128:
            tile_t = 128
        else:
            tile_t = T
        t_pad = _round_up(T, tile_t)

        def padt(x):
            return x if t_pad == T else jnp.pad(x, ((0, 0), (0, 0), (0, t_pad - T)))

        z_p = padt(z_p.astype(jnp.float32))
        logs_q = padt(logs_q.astype(jnp.float32))
        m_p = padt(m_p.astype(jnp.float32))
        logs_p = padt(logs_p.astype(jnp.float32))
        z_mask = padt(z_mask.astype(jnp.float32))

        n_tiles = t_pad // tile_t
        spec3 = pl.BlockSpec((B, C, tile_t), lambda i: (0, 0, i))
        mask_spec = pl.BlockSpec((B, 1, tile_t), lambda i: (0, 0, i))
        out_spec = pl.BlockSpec((1, 1, tile_t), lambda i: (i, 0, 0))

        num, den = pl.pallas_call(
            _kl_partial_kernel,
            out_shape=(
                jax.ShapeDtypeStruct((n_tiles, 1, tile_t), jnp.float32),
                jax.ShapeDtypeStruct((n_tiles, 1, tile_t), jnp.float32),
            ),
            grid=(n_tiles,),
            in_specs=[spec3, spec3, spec3, spec3, mask_spec],
            out_specs=(out_spec, out_spec),
            compiler_params=pltpu.CompilerParams(dimension_semantics=("parallel",)),
        )(z_p, logs_q, m_p, logs_p, z_mask)

        return jnp.sum(num) / jnp.sum(den)

    # ------------------------------- forward ---------------------------------- #
    def __call__(
        self,
        waveform,
        waveform_hat,
        z_p,
        logs_q,
        m_p,
        logs_p,
        z_len,
        scores_disc_fake,
        feats_disc_fake,
        feats_disc_real,
        loss_duration,
        use_speaker_encoder_as_loss=False,
        gt_spk_emb=None,
        syn_spk_emb=None,
    ):
        return_dict = {}

        # sequence_mask(z_len) -> [B, T_t] -> unsqueeze(1) -> [B, 1, T_t]
        t_t = z_p.shape[2]
        z_mask = (jnp.arange(t_t)[None, :] < z_len[:, None]).astype(jnp.float32)
        z_mask = z_mask[:, None, :]

        loss_kl = self._kl_loss(z_p, logs_q, m_p, logs_p, z_mask) * self.kl_loss_alpha
        loss_mel = self._mel_l1_mean(waveform, waveform_hat) * self.mel_loss_alpha

        # Tiny scalar losses stay in plain jnp (XLA fuses them under jit); a
        # pallas_call per sub-KB tensor would be pure launch overhead.
        loss_feat = _feature_loss(feats_disc_fake, feats_disc_real) * self.feat_loss_alpha
        loss_gen = _generator_loss(scores_disc_fake) * self.gen_loss_alpha
        loss_dur = jnp.sum(loss_duration.astype(jnp.float32)) * self.dur_loss_alpha

        loss = loss_kl + loss_feat + loss_mel + loss_gen + loss_dur

        if use_speaker_encoder_as_loss:
            loss_se = (
                _cosine_similarity_loss(gt_spk_emb, syn_spk_emb)
                * self.spk_encoder_loss_alpha
            )
            loss = loss + loss_se
            return_dict["loss_spk_encoder"] = loss_se

        return_dict["loss_gen"] = loss_gen
        return_dict["loss_kl"] = loss_kl
        return_dict["loss_feat"] = loss_feat
        return_dict["loss_mel"] = loss_mel
        return_dict["loss_duration"] = loss_dur
        return_dict["loss"] = loss
        return return_dict


# ----------------------------------------------------------------------------- #
# Example run
# ----------------------------------------------------------------------------- #
if __name__ == "__main__":
    key = jax.random.PRNGKey(0)
    keys = jax.random.split(key, 20)

    B, T_wav = 2, 256
    C_lat, T_lat = 8, 16

    waveform = jax.random.normal(keys[0], (B, 1, T_wav), jnp.float32)
    waveform_hat = jax.random.normal(keys[1], (B, 1, T_wav), jnp.float32)

    z_p = jax.random.normal(keys[2], (B, C_lat, T_lat), jnp.float32)
    logs_q = 0.1 * jax.random.normal(keys[3], (B, C_lat, T_lat), jnp.float32)
    m_p = jax.random.normal(keys[4], (B, C_lat, T_lat), jnp.float32)
    logs_p = 0.1 * jax.random.normal(keys[5], (B, C_lat, T_lat), jnp.float32)
    z_len = jnp.array([16, 12], dtype=jnp.int32)

    scores_disc_fake = [
        jax.random.normal(keys[6], (B, 5), jnp.float32),
        jax.random.normal(keys[7], (B, 4), jnp.float32),
        jax.random.normal(keys[8], (B, 6), jnp.float32),
    ]
    feat_shapes = [[(B, 4, 8, 4), (B, 8, 4, 4)], [(B, 4, 16, 2), (B, 8, 8, 2)]]
    feats_disc_fake, feats_disc_real = [], []
    ki = 9
    for disc in feat_shapes:
        fk, rk = [], []
        for shp in disc:
            fk.append(jax.random.normal(keys[ki], shp, jnp.float32)); ki += 1
            rk.append(jax.random.normal(keys[ki], shp, jnp.float32)); ki += 1
        feats_disc_fake.append(fk)
        feats_disc_real.append(rk)

    loss_duration = jax.random.uniform(keys[17], (B, 1, 8), jnp.float32)
    gt_spk_emb = jax.random.normal(keys[18], (B, 32), jnp.float32)
    syn_spk_emb = jax.random.normal(keys[19], (B, 32), jnp.float32)

    loss_mod = VitsGeneratorLossPallas()
    loss_fn = jax.jit(
        loss_mod.__call__, static_argnames=("use_speaker_encoder_as_loss",)
    )
    out = loss_fn(
        waveform,
        waveform_hat,
        z_p,
        logs_q,
        m_p,
        logs_p,
        z_len,
        scores_disc_fake,
        feats_disc_fake,
        feats_disc_real,
        loss_duration,
        use_speaker_encoder_as_loss=True,
        gt_spk_emb=gt_spk_emb,
        syn_spk_emb=syn_spk_emb,
    )
    jax.block_until_ready(out["loss"])
    print("KERNEL_OK")
</pallas_src>

<mosaic_0001>
module attributes {stable_mosaic.version = 11 : i64} {
  func.func @_mel_l1_kernel(%arg0: i32, %arg1: memref<32x64xbf16, #tpu.memory_space<vmem>>, %arg2: memref<32x64xbf16, #tpu.memory_space<vmem>>, %arg3: memref<64x256xbf16, #tpu.memory_space<vmem>>, %arg4: memref<128x128xf32, #tpu.memory_space<vmem>>, %arg5: memref<1x1x128xf32, #tpu.memory_space<vmem>>) attributes {dimension_semantics = [#tpu.dimension_semantics<parallel>], iteration_bounds = array<i64: 1>, scalar_prefetch = 0 : i64, scratch_operands = 0 : i64, tpu.core_type = #tpu.core_type<tc>, window_params = [{transform_indices = @transform_0, window_bounds = array<i64: 32, 64>}, {transform_indices = @transform_1, window_bounds = array<i64: 32, 64>}, {pipeline_mode = #tpu.pipeline_mode<synchronous>, transform_indices = @transform_2, window_bounds = array<i64: 64, 256>}, {pipeline_mode = #tpu.pipeline_mode<synchronous>, transform_indices = @transform_3, window_bounds = array<i64: 128, 128>}, {transform_indices = @transform_4, window_bounds = array<i64: 1, 1, 128>}]} {
    %c0 = arith.constant 0 : index
    %c0_0 = arith.constant 0 : index
    %0 = vector.load %arg3[%c0, %c0_0] : memref<64x256xbf16, #tpu.memory_space<vmem>>, vector<64x256xbf16>
    %c0_1 = arith.constant 0 : index
    %c0_2 = arith.constant 0 : index
    %1 = vector.load %arg4[%c0_1, %c0_2] : memref<128x128xf32, #tpu.memory_space<vmem>>, vector<128x128xf32>
    %c0_3 = arith.constant 0 : index
    %c0_4 = arith.constant 0 : index
    %2 = vector.load %arg1[%c0_3, %c0_4] : memref<32x64xbf16, #tpu.memory_space<vmem>>, vector<32x64xbf16>
    %cst = arith.constant dense<0.000000e+00> : vector<32x256xf32>
    %3 = tpu.matmul %2, %0, %cst {dimension_numbers = #tpu.dot_dimension_numbers<[1], [0], [0], [1], [0, 0, 1, 1], [], []>} : vector<32x64xbf16>, vector<64x256xbf16>, vector<32x256xf32> -> vector<32x256xf32>
    %4 = vector.extract_strided_slice %3 {offsets = [0, 0], sizes = [32, 128], strides = [1, 1]} : vector<32x256xf32> to vector<32x128xf32>
    %5 = vector.extract_strided_slice %3 {offsets = [0, 128], sizes = [32, 128], strides = [1, 1]} : vector<32x256xf32> to vector<32x128xf32>
    %6 = arith.mulf %4, %4 : vector<32x128xf32>
    %7 = arith.mulf %5, %5 : vector<32x128xf32>
    %8 = arith.addf %6, %7 : vector<32x128xf32>
    %cst_5 = arith.constant 9.99999993E-9 : f32
    %9 = vector.broadcast %cst_5 : f32 to vector<32x128xf32>
    %10 = arith.maximumf %8, %9 : vector<32x128xf32>
    %11 = math.sqrt %10 : vector<32x128xf32>
    %cst_6 = arith.constant dense<0.000000e+00> : vector<32x128xf32>
    %12 = tpu.matmul %11, %1, %cst_6 {dimension_numbers = #tpu.dot_dimension_numbers<[1], [0], [0], [1], [0, 0, 1, 1], [], []>} : vector<32x128xf32>, vector<128x128xf32>, vector<32x128xf32> -> vector<32x128xf32>
    %cst_7 = arith.constant 9.99999974E-6 : f32
    %13 = vector.broadcast %cst_7 : f32 to vector<32x128xf32>
    %14 = arith.maximumf %12, %13 : vector<32x128xf32>
    %15 = math.log %14 : vector<32x128xf32>
    %c0_8 = arith.constant 0 : index
    %c0_9 = arith.constant 0 : index
    %16 = vector.load %arg2[%c0_8, %c0_9] : memref<32x64xbf16, #tpu.memory_space<vmem>>, vector<32x64xbf16>
    %cst_10 = arith.constant dense<0.000000e+00> : vector<32x256xf32>
    %17 = tpu.matmul %16, %0, %cst_10 {dimension_numbers = #tpu.dot_dimension_numbers<[1], [0], [0], [1], [0, 0, 1, 1], [], []>} : vector<32x64xbf16>, vector<64x256xbf16>, vector<32x256xf32> -> vector<32x256xf32>
    %18 = vector.extract_strided_slice %17 {offsets = [0, 0], sizes = [32, 128], strides = [1, 1]} : vector<32x256xf32> to vector<32x128xf32>
    %19 = vector.extract_strided_slice %17 {offsets = [0, 128], sizes = [32, 128], strides = [1, 1]} : vector<32x256xf32> to vector<32x128xf32>
    %20 = arith.mulf %18, %18 : vector<32x128xf32>
    %21 = arith.mulf %19, %19 : vector<32x128xf32>
    %22 = arith.addf %20, %21 : vector<32x128xf32>
    %cst_11 = arith.constant 9.99999993E-9 : f32
    %23 = vector.broadcast %cst_11 : f32 to vector<32x128xf32>
    %24 = arith.maximumf %22, %23 : vector<32x128xf32>
    %25 = math.sqrt %24 : vector<32x128xf32>
    %cst_12 = arith.constant dense<0.000000e+00> : vector<32x128xf32>
    %26 = tpu.matmul %25, %1, %cst_12 {dimension_numbers = #tpu.dot_dimension_numbers<[1], [0], [0], [1], [0, 0, 1, 1], [], []>} : vector<32x128xf32>, vector<128x128xf32>, vector<32x128xf32> -> vector<32x128xf32>
    %cst_13 = arith.constant 9.99999974E-6 : f32
    %27 = vector.broadcast %cst_13 : f32 to vector<32x128xf32>
    %28 = arith.maximumf %26, %27 : vector<32x128xf32>
    %29 = math.log %28 : vector<32x128xf32>
    %30 = arith.subf %15, %29 : vector<32x128xf32>
    %31 = math.absf %30 : vector<32x128xf32>
    %cst_14 = arith.constant dense<0.000000e+00> : vector<128xf32>
    %32 = vector.multi_reduction <add>, %31, %cst_14 [0] : vector<32x128xf32> to vector<128xf32>
    %33 = vector.shape_cast %32 : vector<128xf32> to vector<1x128xf32>
    %34 = vector.shape_cast %33 : vector<1x128xf32> to vector<1x1x128xf32>
    %c0_15 = arith.constant 0 : index
    %c0_16 = arith.constant 0 : index
    %c0_17 = arith.constant 0 : index
    %35 = vector.load %arg5[%c0_15, %c0_16, %c0_17] : memref<1x1x128xf32, #tpu.memory_space<vmem>>, vector<1x1x128xf32>
    tpu.vector_store %arg5[%c0_15, %c0_16, %c0_17], %34 {strides = array<i32>} : memref<1x1x128xf32, #tpu.memory_space<vmem>>, vector<1x1x128xf32>,
    return
  }
  func.func @transform_0(%arg0: i32) -> (i32, i32) {
    %c0_i32 = arith.constant 0 : i32
    %c0_i32_0 = arith.constant 0 : i32
    return %arg0, %c0_i32 : i32, i32
  }
  func.func @transform_1(%arg0: i32) -> (i32, i32) {
    %c0_i32 = arith.constant 0 : i32
    %c0_i32_0 = arith.constant 0 : i32
    return %arg0, %c0_i32 : i32, i32
  }
  func.func @transform_2(%arg0: i32) -> (i32, i32) {
    %c0_i32 = arith.constant 0 : i32
    %c0_i32_0 = arith.constant 0 : i32
    %c0_i32_1 = arith.constant 0 : i32
    return %c0_i32, %c0_i32_0 : i32, i32
  }
  func.func @transform_3(%arg0: i32) -> (i32, i32) {
    %c0_i32 = arith.constant 0 : i32
    %c0_i32_0 = arith.constant 0 : i32
    %c0_i32_1 = arith.constant 0 : i32
    return %c0_i32, %c0_i32_0 : i32, i32
  }
  func.func @transform_4(%arg0: i32) -> (i32, i32, i32) {
    %c0_i32 = arith.constant 0 : i32
    %c0_i32_0 = arith.constant 0 : i32
    %c0_i32_1 = arith.constant 0 : i32
    return %arg0, %c0_i32, %c0_i32_0 : i32, i32, i32
  }
}

module attributes {stable_mosaic.version = 11 : i64} {
  func.func @_kl_partial_kernel(%arg0: i32, %arg1: memref<2x8x16xf32, #tpu.memory_space<vmem>>, %arg2: memref<2x8x16xf32, #tpu.memory_space<vmem>>, %arg3: memref<2x8x16xf32, #tpu.memory_space<vmem>>, %arg4: memref<2x8x16xf32, #tpu.memory_space<vmem>>, %arg5: memref<2x1x16xf32, #tpu.memory_space<vmem>>, %arg6: memref<1x1x16xf32, #tpu.memory_space<vmem>>, %arg7: memref<1x1x16xf32, #tpu.memory_space<vmem>>) attributes {dimension_semantics = [#tpu.dimension_semantics<parallel>], iteration_bounds = array<i64: 1>, scalar_prefetch = 0 : i64, scratch_operands = 0 : i64, tpu.core_type = #tpu.core_type<tc>, window_params = [{transform_indices = @transform_0, window_bounds = array<i64: 2, 8, 16>}, {transform_indices = @transform_1, window_bounds = array<i64: 2, 8, 16>}, {transform_indices = @transform_2, window_bounds = array<i64: 2, 8, 16>}, {transform_indices = @transform_3, window_bounds = array<i64: 2, 8, 16>}, {transform_indices = @transform_4, window_bounds = array<i64: 2, 1, 16>}, {transform_indices = @transform_5, window_bounds = array<i64: 1, 1, 16>}, {transform_indices = @transform_6, window_bounds = array<i64: 1, 1, 16>}]} {
    %c0 = arith.constant 0 : index
    %c0_0 = arith.constant 0 : index
    %c0_1 = arith.constant 0 : index
    %0 = vector.load %arg1[%c0, %c0_0, %c0_1] : memref<2x8x16xf32, #tpu.memory_space<vmem>>, vector<2x8x16xf32>
    %c0_2 = arith.constant 0 : index
    %c0_3 = arith.constant 0 : index
    %c0_4 = arith.constant 0 : index
    %1 = vector.load %arg2[%c0_2, %c0_3, %c0_4] : memref<2x8x16xf32, #tpu.memory_space<vmem>>, vector<2x8x16xf32>
    %c0_5 = arith.constant 0 : index
    %c0_6 = arith.constant 0 : index
    %c0_7 = arith.constant 0 : index
    %2 = vector.load %arg3[%c0_5, %c0_6, %c0_7] : memref<2x8x16xf32, #tpu.memory_space<vmem>>, vector<2x8x16xf32>
    %c0_8 = arith.constant 0 : index
    %c0_9 = arith.constant 0 : index
    %c0_10 = arith.constant 0 : index
    %3 = vector.load %arg4[%c0_8, %c0_9, %c0_10] : memref<2x8x16xf32, #tpu.memory_space<vmem>>, vector<2x8x16xf32>
    %c0_11 = arith.constant 0 : index
    %c0_12 = arith.constant 0 : index
    %c0_13 = arith.constant 0 : index
    %4 = vector.load %arg5[%c0_11, %c0_12, %c0_13] : memref<2x1x16xf32, #tpu.memory_space<vmem>>, vector<2x1x16xf32>
    %5 = arith.subf %3, %1 : vector<2x8x16xf32>
    %cst = arith.constant 5.000000e-01 : f32
    %6 = vector.broadcast %cst : f32 to vector<2x8x16xf32>
    %7 = arith.subf %5, %6 : vector<2x8x16xf32>
    %8 = arith.subf %0, %2 : vector<2x8x16xf32>
    %9 = arith.mulf %8, %8 : vector<2x8x16xf32>
    %cst_14 = arith.constant 5.000000e-01 : f32
    %10 = vector.broadcast %cst_14 : f32 to vector<2x8x16xf32>
    %11 = arith.mulf %10, %9 : vector<2x8x16xf32>
    %cst_15 = arith.constant -2.000000e+00 : f32
    %12 = vector.broadcast %cst_15 : f32 to vector<2x8x16xf32>
    %13 = arith.mulf %12, %3 : vector<2x8x16xf32>
    %14 = math.exp %13 : vector<2x8x16xf32>
    %15 = arith.mulf %11, %14 : vector<2x8x16xf32>
    %16 = arith.addf %7, %15 : vector<2x8x16xf32>
    %17 = vector.broadcast %4 : vector<2x1x16xf32> to vector<2x8x16xf32>
    %18 = arith.mulf %16, %17 : vector<2x8x16xf32>
    %cst_16 = arith.constant dense<0.000000e+00> : vector<16xf32>
    %19 = vector.multi_reduction <add>, %18, %cst_16 [0, 1] : vector<2x8x16xf32> to vector<16xf32>
    %20 = vector.shape_cast %19 : vector<16xf32> to vector<1x1x16xf32>
    %c0_17 = arith.constant 0 : index
    %c0_18 = arith.constant 0 : index
    %c0_19 = arith.constant 0 : index
    %21 = vector.load %arg6[%c0_17, %c0_18, %c0_19] : memref<1x1x16xf32, #tpu.memory_space<vmem>>, vector<1x1x16xf32>
    tpu.vector_store %arg6[%c0_17, %c0_18, %c0_19], %20 {strides = array<i32>} : memref<1x1x16xf32, #tpu.memory_space<vmem>>, vector<1x1x16xf32>,
    %cst_20 = arith.constant dense<0.000000e+00> : vector<16xf32>
    %22 = vector.multi_reduction <add>, %4, %cst_20 [0, 1] : vector<2x1x16xf32> to vector<16xf32>
    %23 = vector.shape_cast %22 : vector<16xf32> to vector<1x1x16xf32>
    %c0_21 = arith.constant 0 : index
    %c0_22 = arith.constant 0 : index
    %c0_23 = arith.constant 0 : index
    %24 = vector.load %arg7[%c0_21, %c0_22, %c0_23] : memref<1x1x16xf32, #tpu.memory_space<vmem>>, vector<1x1x16xf32>
    tpu.vector_store %arg7[%c0_21, %c0_22, %c0_23], %23 {strides = array<i32>} : memref<1x1x16xf32, #tpu.memory_space<vmem>>, vector<1x1x16xf32>,
    return
  }
  func.func @transform_0(%arg0: i32) -> (i32, i32, i32) {
    %c0_i32 = arith.constant 0 : i32
    %c0_i32_0 = arith.constant 0 : i32
    %c0_i32_1 = arith.constant 0 : i32
    return %c0_i32, %c0_i32_0, %arg0 : i32, i32, i32
  }
  func.func @transform_1(%arg0: i32) -> (i32, i32, i32) {
    %c0_i32 = arith.constant 0 : i32
    %c0_i32_0 = arith.constant 0 : i32
    %c0_i32_1 = arith.constant 0 : i32
    return %c0_i32, %c0_i32_0, %arg0 : i32, i32, i32
  }
  func.func @transform_2(%arg0: i32) -> (i32, i32, i32) {
    %c0_i32 = arith.constant 0 : i32
    %c0_i32_0 = arith.constant 0 : i32
    %c0_i32_1 = arith.constant 0 : i32
    return %c0_i32, %c0_i32_0, %arg0 : i32, i32, i32
  }
  func.func @transform_3(%arg0: i32) -> (i32, i32, i32) {
    %c0_i32 = arith.constant 0 : i32
    %c0_i32_0 = arith.constant 0 : i32
    %c0_i32_1 = arith.constant 0 : i32
    return %c0_i32, %c0_i32_0, %arg0 : i32, i32, i32
  }
  func.func @transform_4(%arg0: i32) -> (i32, i32, i32) {
    %c0_i32 = arith.constant 0 : i32
    %c0_i32_0 = arith.constant 0 : i32
    %c0_i32_1 = arith.constant 0 : i32
    return %c0_i32, %c0_i32_0, %arg0 : i32, i32, i32
  }
  func.func @transform_5(%arg0: i32) -> (i32, i32, i32) {
    %c0_i32 = arith.constant 0 : i32
    %c0_i32_0 = arith.constant 0 : i32
    %c0_i32_1 = arith.constant 0 : i32
    return %arg0, %c0_i32, %c0_i32_0 : i32, i32, i32
  }
  func.func @transform_6(%arg0: i32) -> (i32, i32, i32) {
    %c0_i32 = arith.constant 0 : i32
    %c0_i32_0 = arith.constant 0 : i32
    %c0_i32_1 = arith.constant 0 : i32
    return %arg0, %c0_i32, %c0_i32_0 : i32, i32, i32
  }
}

</mosaic_0001>

<bundles_post_ra>
// kernel: a_call__.2
= control target key start
LH: loop header
LB: loop body
LE: loop exit
PB: predicated region body
PF: predicated region fallthrough
CT: control target
= control target key end

     0   :  { %vm76_vm0 = vcmask 122880   ;;  %v54_v14 = vlaneseq  ;;  %vm66_vm1 = vcmask 130048   ;;  %s177_s3 = inlined_call_operand.vmem [shape: f32[2,8,16], index: 3, kind: input, shape index: {}]   ;;  %s178_s0 = inlined_call_operand.vmem [shape: f32[2,8,16], index: 0, kind: input, shape index: {}]   ;;  %s179_s2 = inlined_call_operand.vmem [shape: f32[2,8,16], index: 2, kind: input, shape index: {}]   ;;  %s180_s4 = inlined_call_operand.vmem [shape: f32[2,1,16], index: 4, kind: input, shape index: {}]   ;;  %s181_s1 = inlined_call_operand.vmem [shape: f32[2,8,16], index: 1, kind: input, shape index: {}]   ;;  %s182_s6 = inlined_call_operand.vmem [shape: f32[1,1,16], index: 6, kind: output, shape index: {1}]   ;;  %s183_s5 = inlined_call_operand.vmem [shape: f32[1,1,16], index: 5, kind: output, shape index: {0}]  }
   0x1   :  { %v28_v0 = vld [vmem:[%s177_s3] sm:$0xff]  ;;  %v29_v1 = vld [vmem:[%s177_s3 + $0x8] sm:$0xff] }
   0x2   :  { %v22_v2 = vld [vmem:[%s178_s0] sm:$0xff]  ;;  %v42_v4 = vmul.f32 -2.0, %v28_v0  ;;  %v43_v5 = vmul.f32 -2.0, %v29_v1  ;;  %v23_v6 = vld [vmem:[%s178_s0 + $0x8] sm:$0xff]  ;;  %v55_v21 = vshrl.u32 %v54_v14, 7 }
   0x3   :  { %v26_v3 = vld [vmem:[%s179_s2] sm:$0xff]  ;;  %v27_v7 = vld [vmem:[%s179_s2 + $0x8] sm:$0xff] }
   0x4   :  { %v30_v8 = vld [vmem:[%s180_s4] sm:$0x1]  ;;  %v44_v9 = vmul.f32 1.442695, %v42_v4  ;;  %v46_v10 = vmul.f32 1.442695, %v43_v5  ;;  %v36_v13 = vsub.f32 %v22_v2, %v26_v3  ;;  %v37_v15 = vsub.f32 %v23_v6, %v27_v7 }
   0x5   :  { %v78_v11 = vsel %vm76_vm0, %v30_v8, 0.0  ;;  %v31_v12 = vld [vmem:[%s180_s4 + $0x1] sm:$0x1]  ;;  %v25_v19 = vld [vmem:[%s181_s1 + $0x8] sm:$0xff]  ;;  %v56_v28 = vsub.s32 0, %v55_v21 }
   0x6   :  { %98 = vpow2.f32 %v44_v9  ;;  %v79_v16 = vsel %vm76_vm0, %v31_v12, 0.0  ;;  %v24_v18 = vld [vmem:[%s181_s1] sm:$0xff]  ;;  %v38_v20 = vmul.f32 %v36_v13, %v36_v13  ;;  %v39_v23 = vmul.f32 %v37_v15, %v37_v15 }
   0x7   :  { %100 = vpow2.f32 %v46_v10  ;;  %v80_v17 = vadd.f32 %v79_v16, %v78_v11  ;;  %v32_v24 = vsub.f32 %v28_v0, %v24_v18  ;;  %v33_v26 = vsub.f32 %v29_v1, %v25_v19 }
   0x8   :  { %v40_v27 = vmul.f32 0.5, %v38_v20  ;;  %v41_v30 = vmul.f32 0.5, %v39_v23  ;;  %v57_v37 = vrot.slane %v30_v8, %v56_v28  ;;  %v61_v40 = vrot.slane %v31_v12, %v56_v28 }
   0x9   :  { %v81_v22 = vrot.slane %v80_v17, 4  ;;  %v96_v31 = vadd.f32 -0.5, %v32_v24  ;;  %v97_v34 = vadd.f32 -0.5, %v33_v26 }
   0xb   :  { %v82_v25 = vadd.f32 %v81_v22, %v80_v17 }
   0xd   :  { %v83_v29 = vrot.slane %v82_v25, 2 }
   0xf   :  { %v84_v32 = vadd.f32 %v83_v29, %v82_v25 }
  0x10   :  { %v99_v33 = vpop.eup %98 }
  0x11   :  { %v101_v35 = vpop.eup %100  ;;  %v48_v36 = vmul.f32 %v99_v33, %v40_v27  ;;  %v85_v38 = vrot.slane %v84_v32, 1 }
  0x12   :  { %v49_v39 = vmul.f32 %v101_v35, %v41_v30 }
  0x13   :  { %v50_v41 = vadd.f32 %v96_v31, %v48_v36  ;;  %v86_v42 = vadd.f32 %v85_v38, %v84_v32 }
  0x14   :  { %v51_v43 = vadd.f32 %v97_v34, %v49_v39 }
  0x15   :  { %v64_v44 = vmul.f32 %v57_v37, %v50_v41  ;;  %87 = vst.msk [vmem:[%s182_s6] sm:$0x1] %vm76_vm0, %v86_v42 }
  0x16   :  { %v65_v45 = vmul.f32 %v61_v40, %v51_v43 }
  0x17   :  { %v67_v46 = vsel %vm66_vm1, %v64_v44, 0.0 }
  0x18   :  { %v68_v47 = vsel %vm66_vm1, %v65_v45, 0.0 }
  0x19   :  { %v69_v48 = vadd.f32 %v68_v47, %v67_v46 }
  0x1b   :  { %v70_v49 = vrot.slane %v69_v48, 4 }
  0x1d   :  { %v71_v50 = vadd.f32 %v70_v49, %v69_v48 }
  0x1f   :  { %v72_v51 = vrot.slane %v71_v50, 2 }
  0x21   :  { %v73_v52 = vadd.f32 %v72_v51, %v71_v50 }
  0x23   :  { %v74_v53 = vrot.slane %v73_v52, 1 }
  0x25   :  { %v75_v54 = vadd.f32 %v74_v53, %v73_v52 }
  0x27   :  { %77 = vst.msk [vmem:[%s183_s5] sm:$0x1] %vm76_vm0, %v75_v54 }

// kernel: a_call__.3
= control target key start
LH: loop header
LB: loop body
LE: loop exit
PB: predicated region body
PF: predicated region fallthrough
CT: control target
= control target key end

     0   :  { %v778_v1 = vmov 0   ;;  %vm96_vm0 = vcmask 523264   ;;  %s927_s2 = inlined_call_operand.vmem [shape: bf16[64,256], index: 2, kind: input, shape index: {}]   ;;  %s928_s0 = inlined_call_operand.vmem [shape: bf16[32,64], index: 0, kind: input, shape index: {}]   ;;  %s929_s1 = inlined_call_operand.vmem [shape: bf16[32,64], index: 1, kind: input, shape index: {}]   ;;  %s930_s3 = inlined_call_operand.vmem [shape: f32[128,128], index: 3, kind: input, shape index: {}]   ;;  %s931_s4 = inlined_call_operand.vmem [shape: f32[1,1,128], index: 4, kind: output, shape index: {}]  }
   0x1   :  { %v730_v0 = vld [vmem:[%s927_s2 + $0x4] ss:$8 sps:$4 sm:$0xff]   ;;  %135 = vmatprep.mubr.bf16.mxu1 %v778_v1  ;;  %349 = vmatprep.mubr.bf16.mxu0 %v778_v1  ;;  %v732_v2 = vld [vmem:[%s927_s2] ss:$8 sps:$4 sm:$0xff]   ;;  %v733_v3 = vld [vmem:[%s927_s2 + $0x14] ss:$8 sps:$4 sm:$0xff]  }
   0x2   :  { %103 = vmatprep.subr.bf16.mxu1 %v730_v0  ;;  %317 = vmatprep.subr.bf16.mxu0 %v730_v0  ;;  %v735_v4 = vld [vmem:[%s927_s2 + $0x10] ss:$8 sps:$4 sm:$0xff]   ;;  %v736_v5 = vld [vmem:[%s927_s2 + $0x24] ss:$8 sps:$4 sm:$0xff]   ;;  %v738_v6 = vld [vmem:[%s927_s2 + $0x20] ss:$8 sps:$4 sm:$0xff]  }
   0x3   :  { %104 = vmatpush1.bf16.msra.mxu1 %v732_v2  ;;  %318 = vmatpush1.bf16.msra.mxu0 %v732_v2  ;;  %v739_v7 = vld [vmem:[%s927_s2 + $0x34] ss:$8 sps:$4 sm:$0xff]   ;;  %v26_v8 = vld [vmem:[%s930_s3] sm:$0xff]  ;;  %v27_v9 = vld [vmem:[%s930_s3 + $0x8] sm:$0xff] }
   0x4   :  { %105 = vmatprep.subr.bf16.mxu1 %v733_v3  ;;  %319 = vmatprep.subr.bf16.mxu0 %v733_v3  ;;  %v741_v10 = vld [vmem:[%s927_s2 + $0x30] ss:$8 sps:$4 sm:$0xff]   ;;  %v665_v11 = vpack.c.bf16 %v27_v9, %v26_v8  ;;  %v742_v12 = vld [vmem:[%s928_s0] sm:$0xff]   ;;  %v744_v17 = vld [vmem:[%s928_s0 + $0x8] sm:$0xff]  }
   0x5   :  { %v743_v13 = vld [vmem:[%s929_s1] sm:$0xff]   ;;  %v28_v14 = vld [vmem:[%s930_s3 + $0x10] sm:$0xff]  ;;  %v29_v15 = vld [vmem:[%s930_s3 + $0x18] sm:$0xff] }
   0x6   :  { %v669_v16 = vpack.c.bf16 %v29_v15, %v28_v14  ;;  %v745_v18 = vld [vmem:[%s929_s1 + $0x8] sm:$0xff]   ;;  %v30_v19 = vld [vmem:[%s930_s3 + $0x20] sm:$0xff]  ;;  %v32_v22 = vld [vmem:[%s930_s3 + $0x30] sm:$0xff] }
   0x7   :  { %106 = vmatpush1.bf16.msra.mxu1 %v735_v4  ;;  %320 = vmatpush1.bf16.msra.mxu0 %v735_v4  ;;  %v31_v20 = vld [vmem:[%s930_s3 + $0x28] sm:$0xff]  ;;  %v33_v23 = vld [vmem:[%s930_s3 + $0x38] sm:$0xff]  ;;  %v34_v25 = vld [vmem:[%s930_s3 + $0x40] sm:$0xff] }
   0x8   :  { %107 = vmatprep.subr.bf16.mxu1 %v736_v5  ;;  %321 = vmatprep.subr.bf16.mxu0 %v736_v5  ;;  %v673_v21 = vpack.c.bf16 %v31_v20, %v30_v19  ;;  %v677_v24 = vpack.c.bf16 %v33_v23, %v32_v22  ;;  %v35_v26 = vld [vmem:[%s930_s3 + $0x48] sm:$0xff]  ;;  %v36_v28 = vld [vmem:[%s930_s3 + $0x50] sm:$0xff]  ;;  %v37_v29 = vld [vmem:[%s930_s3 + $0x58] sm:$0xff] }
   0x9   :  { %v681_v27 = vpack.c.bf16 %v35_v26, %v34_v25  ;;  %v685_v30 = vpack.c.bf16 %v37_v29, %v36_v28  ;;  %v38_v31 = vld [vmem:[%s930_s3 + $0x60] sm:$0xff]  ;;  %v39_v32 = vld [vmem:[%s930_s3 + $0x68] sm:$0xff]  ;;  %v40_v34 = vld [vmem:[%s930_s3 + $0x70] sm:$0xff] }
   0xa   :  { %v689_v33 = vpack.c.bf16 %v39_v32, %v38_v31  ;;  %v41_v35 = vld [vmem:[%s930_s3 + $0x78] sm:$0xff] }
   0xb   :  { %108 = vmatpush1.bf16.msra.mxu1 %v738_v6  ;;  %322 = vmatpush1.bf16.msra.mxu0 %v738_v6  ;;  %v693_v36 = vpack.c.bf16 %v41_v35, %v40_v34 }
   0xc   :  { %109 = vmatprep.subr.bf16.mxu1 %v739_v7  ;;  %323 = vmatprep.subr.bf16.mxu0 %v739_v7 }
   0xf   :  { %110 = vmatpush1.bf16.msra.mxu1 %v741_v10  ;;  %324 = vmatpush1.bf16.msra.mxu0 %v741_v10 }
  0x10   :  { %666 = vmatprep.subr.bf16.mxu1 %v665_v11  ;;  %698 = vmatprep.subr.bf16.mxu0 %v665_v11 }
  0x12   :  { %543 = vmatmul.mubr.msk.bf16.vlgmr.msra.gmra.mrb[0].mxu1 %vm96_vm0, %v742_v12  ;;  %547 = vmatmul.mubr.msk.bf16.vlgmr.msra.gmra.mrb[0].mxu0 %vm96_vm0, %v743_v13 }
  0x13   :  { %145 = vmatprep.mubr.bf16.mxu1 %v778_v1  ;;  %359 = vmatprep.mubr.bf16.mxu0 %v778_v1 }
  0x14   :  { %668 = vmatpush3.bf16.msra.mxu1 %v665_v11  ;;  %700 = vmatpush3.bf16.msra.mxu0 %v665_v11 }
  0x15   :  { %670 = vmatprep.subr.bf16.mxu1 %v669_v16  ;;  %702 = vmatprep.subr.bf16.mxu0 %v669_v16 }
  0x18   :  { %672 = vmatpush3.bf16.msra.mxu1 %v669_v16  ;;  %704 = vmatpush3.bf16.msra.mxu0 %v669_v16 }
  0x19   :  { %674 = vmatprep.subr.bf16.mxu1 %v673_v21  ;;  %706 = vmatprep.subr.bf16.mxu0 %v673_v21 }
  0x1a   :  { %544 = vmatmul.mubr.msk.bf16.gmra.mrb[4].mxu1 %vm96_vm0, %v744_v17  ;;  %548 = vmatmul.mubr.msk.bf16.gmra.mrb[4].mxu0 %vm96_vm0, %v745_v18 }
  0x1c   :  { %676 = vmatpush3.bf16.msra.mxu1 %v673_v21  ;;  %708 = vmatpush3.bf16.msra.mxu0 %v673_v21 }
  0x1d   :  { %678 = vmatprep.subr.bf16.mxu1 %v677_v24  ;;  %710 = vmatprep.subr.bf16.mxu0 %v677_v24 }
  0x20   :  { %680 = vmatpush3.bf16.msra.mxu1 %v677_v24  ;;  %712 = vmatpush3.bf16.msra.mxu0 %v677_v24 }
  0x21   :  { %682 = vmatprep.subr.bf16.mxu1 %v681_v27  ;;  %714 = vmatprep.subr.bf16.mxu0 %v681_v27 }
  0x24   :  { %684 = vmatpush3.bf16.msra.mxu1 %v681_v27  ;;  %716 = vmatpush3.bf16.msra.mxu0 %v681_v27 }
  0x25   :  { %686 = vmatprep.subr.bf16.mxu1 %v685_v30  ;;  %718 = vmatprep.subr.bf16.mxu0 %v685_v30 }
  0x28   :  { %688 = vmatpush3.bf16.msra.mxu1 %v685_v30  ;;  %720 = vmatpush3.bf16.msra.mxu0 %v685_v30 }
  0x29   :  { %690 = vmatprep.subr.bf16.mxu1 %v689_v33  ;;  %722 = vmatprep.subr.bf16.mxu0 %v689_v33 }
  0x2c   :  { %692 = vmatpush3.bf16.msra.mxu1 %v689_v33  ;;  %724 = vmatpush3.bf16.msra.mxu0 %v689_v33 }
  0x2d   :  { %694 = vmatprep.subr.bf16.mxu1 %v693_v36  ;;  %726 = vmatprep.subr.bf16.mxu0 %v693_v36 }
  0x30   :  { %696 = vmatpush3.bf16.msra.mxu1 %v693_v36  ;;  %728 = vmatpush3.bf16.msra.mxu0 %v693_v36 }
  0xe5   :  { %v137_v37 = vpop.f32.mrb[0].mxu1  ;;  %v351_v38 = vpop.f32.mrb[0].mxu0 }
  0xe6   :  { %v156_v39 = vmul.f32 %v137_v37, %v137_v37  ;;  %v370_v40 = vmul.f32 %v351_v38, %v351_v38  ;;  %v139_v41 = vpop.f32.mrb[1].mxu1  ;;  %v353_v42 = vpop.f32.mrb[1].mxu0 }
  0xe7   :  { %v160_v43 = vmul.f32 %v139_v41, %v139_v41  ;;  %v374_v44 = vmul.f32 %v353_v42, %v353_v42  ;;  %v141_v45 = vpop.f32.mrb[2].mxu1  ;;  %v355_v46 = vpop.f32.mrb[2].mxu0 }
  0xe8   :  { %v157_v47 = vmul.f32 %v141_v45, %v141_v45  ;;  %v371_v48 = vmul.f32 %v355_v46, %v355_v46  ;;  %v143_v49 = vpop.f32.mrb[3].mxu1  ;;  %v357_v50 = vpop.f32.mrb[3].mxu0 }
  0xe9   :  { %v164_v51 = vadd.f32 %v160_v43, %v156_v39  ;;  %v378_v52 = vadd.f32 %v374_v44, %v370_v40  ;;  %v161_v53 = vmul.f32 %v143_v49, %v143_v49  ;;  %v375_v54 = vmul.f32 %v357_v50, %v357_v50 }
  0xeb   :  { %v168_v55 = vmax.f32 %v164_v51, 1e-08  ;;  %v165_v56 = vadd.f32 %v161_v53, %v157_v47  ;;  %v379_v57 = vadd.f32 %v375_v54, %v371_v48  ;;  %v894_v62 = vmax.f32 %v378_v52, 1e-08 }
  0xed   :  { %v169_v58 = vmax.f32 %v165_v56, 1e-08  ;;  %v892_v59 = vmax.f32 %v379_v57, 1e-08  ;;  %v147_v60 = vpop.f32.mrb[4].mxu1  ;;  %v361_v61 = vpop.f32.mrb[4].mxu0  ;;  %746 = vrsqrt.f32 %v168_v55 }
  0xee   :  { %v158_v63 = vmul.f32 %v147_v60, %v147_v60  ;;  %v372_v0 = vmul.f32 %v361_v61, %v361_v61  ;;  %v149_v1 = vpop.f32.mrb[5].mxu1  ;;  %v363_v2 = vpop.f32.mrb[5].mxu0  ;;  %vm174_vm1 = vcmp.eq.f32.partialorder %v168_v55, inf  ;;  %v177_v24 = vand.u32 2147483648, %v168_v55 }
  0xef   :  { %748 = vrsqrt.f32 %v169_v58  ;;  %v162_v3 = vmul.f32 %v149_v1, %v149_v1  ;;  %v376_v4 = vmul.f32 %v363_v2, %v363_v2  ;;  %v151_v5 = vpop.f32.mrb[6].mxu1  ;;  %v365_v6 = vpop.f32.mrb[6].mxu0  ;;  %vm176_vm2 = vcmp.eq.f32.partialorder %v168_v55, 0.0 }
  0xf0   :  { %750 = vrsqrt.f32 %v892_v59  ;;  %v159_v7 = vmul.f32 %v151_v5, %v151_v5  ;;  %v373_v8 = vmul.f32 %v365_v6, %v365_v6  ;;  %v153_v9 = vpop.f32.mrb[7].mxu1  ;;  %v367_v10 = vpop.f32.mrb[7].mxu0  ;;  %vm181_vm3 = vcmp.eq.f32.partialorder %v169_v58, inf }
  0xf1   :  { %v166_v11 = vadd.f32 %v162_v3, %v158_v63  ;;  %v380_v12 = vadd.f32 %v376_v4, %v372_v0  ;;  %v163_v13 = vmul.f32 %v153_v9, %v153_v9  ;;  %v377_v14 = vmul.f32 %v367_v10, %v367_v10 }
  0xf2   :  { %752 = vrsqrt.f32 %v894_v62  ;;  %v184_v29 = vand.u32 2147483648, %v169_v58  ;;  %vm183_vm4 = vcmp.eq.f32.partialorder %v169_v58, 0.0  ;;  %vm395_vm5 = vcmp.eq.f32.partialorder %v892_v59, inf }
  0xf3   :  { %v170_v15 = vmax.f32 %v166_v11, 1e-08  ;;  %v384_v16 = vmax.f32 %v380_v12, 1e-08  ;;  %v167_v17 = vadd.f32 %v163_v13, %v159_v7  ;;  %v381_v18 = vadd.f32 %v377_v14, %v373_v8 }
  0xf4   :  { %v398_v36 = vand.u32 2147483648, %v892_v59  ;;  %vm388_vm6 = vcmp.eq.f32.partialorder %v894_v62, inf  ;;  %v391_v37 = vand.u32 2147483648, %v894_v62  ;;  %vm397_vm7 = vcmp.eq.f32.partialorder %v892_v59, 0.0 }
  0xf5   :  { %v898_v19 = vmax.f32 %v167_v17, 1e-08  ;;  %v900_v20 = vmax.f32 %v381_v18, 1e-08  ;;  %754 = vrsqrt.f32 %v170_v15  ;;  %vm390_vm8 = vcmp.eq.f32.partialorder %v894_v62, 0.0 }
  0xf6   :  { %756 = vrsqrt.f32 %v384_v16  ;;  %vm188_vm9 = vcmp.eq.f32.partialorder %v170_v15, inf  ;;  %vm190_vm10 = vcmp.eq.f32.partialorder %v170_v15, 0.0  ;;  %v191_v45 = vand.u32 2147483648, %v170_v15 }
  0xf7   :  { %v747_v21 = vpop.eup %746  ;;  %758 = vrsqrt.f32 %v898_v19  ;;  %vm402_vm11 = vcmp.eq.f32.partialorder %v384_v16, inf  ;;  %vm404_vm12 = vcmp.eq.f32.partialorder %v384_v16, 0.0  ;;  %v405_v48 = vand.u32 2147483648, %v384_v16 }
  0xf8   :  { %v173_v22 = vmul.f32 %v747_v21, %v168_v55  ;;  %760 = vrsqrt.f32 %v900_v20  ;;  %vm195_vm13 = vcmp.eq.f32.partialorder %v898_v19, inf  ;;  %v198_v53 = vand.u32 2147483648, %v898_v19 }
  0xf9   :  { %v749_v23 = vpop.eup %748  ;;  %vm197_vm14 = vcmp.eq.f32.partialorder %v898_v19, 0.0  ;;  %vm409_vm15 = vcmp.eq.f32.partialorder %v900_v20, inf  ;;  %vm411_vm0 = vcmp.eq.f32.partialorder %v900_v20, 0.0 }
  0xfa   :  { %v751_v25 = vpop.eup %750  ;;  %v175_v26 = vsel %vm174_vm1, %v168_v55, %v173_v22  ;;  %v180_v27 = vmul.f32 %v749_v23, %v169_v58 }
  0xfb   :  { %v178_v28 = vsel %vm176_vm2, %v177_v24, %v175_v26  ;;  %v394_v30 = vmul.f32 %v751_v25, %v892_v59 }
  0xfc   :  { %v753_v31 = vpop.eup %752  ;;  %621 = vmatprep.mubr.f32.mxu1 %v178_v28  ;;  %v182_v32 = vsel %vm181_vm3, %v169_v58, %v180_v27  ;;  %v412_v58 = vand.u32 2147483648, %v900_v20 }
  0xfd   :  { %v387_v33 = vmul.f32 %v753_v31, %v894_v62  ;;  %v185_v34 = vsel %vm183_vm4, %v184_v29, %v182_v32  ;;  %v396_v35 = vsel %vm395_vm5, %v892_v59, %v394_v30 }
  0xfe   :  { %622 = vmatmul.mubr.f32.vlgmr.msra.gmra.mrb[8].mxu1 %v185_v34  ;;  %v399_v40 = vsel %vm397_vm7, %v398_v36, %v396_v35 }
  0xff   :  { %v755_v38 = vpop.eup %754  ;;  %v389_v39 = vsel %vm388_vm6, %v894_v62, %v387_v33 }
 0x100   :  { %v757_v41 = vpop.eup %756  ;;  %v392_v42 = vsel %vm390_vm8, %v391_v37, %v389_v39  ;;  %v187_v43 = vmul.f32 %v755_v38, %v170_v15 }
 0x101   :  { %v759_v44 = vpop.eup %758  ;;  %659 = vmatprep.mubr.f32.mxu0 %v392_v42  ;;  %v401_v46 = vmul.f32 %v757_v41, %v384_v16 }
 0x102   :  { %660 = vmatmul.mubr.f32.vlgmr.msra.gmra.mrb[8].mxu0 %v399_v40  ;;  %v189_v47 = vsel %vm188_vm9, %v170_v15, %v187_v43  ;;  %v194_v49 = vmul.f32 %v759_v44, %v898_v19  ;;  %v761_v50 = vpop.eup %760 }
 0x103   :  { %v192_v51 = vsel %vm190_vm10, %v191_v45, %v189_v47  ;;  %v403_v52 = vsel %vm402_vm11, %v384_v16, %v401_v46  ;;  %v408_v56 = vmul.f32 %v761_v50, %v900_v20 }
 0x104   :  { %624 = vmatprep.mubr.f32.mxu1 %v192_v51  ;;  %v406_v54 = vsel %vm404_vm12, %v405_v48, %v403_v52  ;;  %v196_v55 = vsel %vm195_vm13, %v898_v19, %v194_v49 }
 0x105   :  { %662 = vmatprep.mubr.f32.mxu0 %v406_v54  ;;  %v199_v57 = vsel %vm197_vm14, %v198_v53, %v196_v55  ;;  %v410_v59 = vsel %vm409_vm15, %v900_v20, %v408_v56 }
 0x106   :  { %625 = vmatmul.mubr.f32.gmra.mrb[10].mxu1 %v199_v57  ;;  %v413_v60 = vsel %vm411_vm0, %v412_v58, %v410_v59 }
 0x107   :  { %663 = vmatmul.mubr.f32.gmra.mrb[10].mxu0 %v413_v60 }
 0x1d1   :  { %v623_v61 = vpop.f32.mrb[8].mxu1 }
 0x1d2   :  { %v286_v62 = vmax.f32 %v623_v61, 1e-05  ;;  %v266_v63 = vpop.f32.mrb[9].mxu1 }
 0x1d3   :  { %v285_v0 = vmax.f32 %v266_v63, 1e-05 }
 0x1d4   :  { %762 = vlog2.f32 %v286_v62 }
 0x1d5   :  { %v661_v1 = vpop.f32.mrb[8].mxu0  ;;  %764 = vlog2.f32 %v285_v0 }
 0x1d6   :  { %v500_v2 = vmax.f32 %v661_v1, 1e-05  ;;  %v480_v3 = vpop.f32.mrb[9].mxu0 }
 0x1d7   :  { %v499_v4 = vmax.f32 %v480_v3, 1e-05 }
 0x1d8   :  { %766 = vlog2.f32 %v500_v2 }
 0x1d9   :  { %768 = vlog2.f32 %v499_v4  ;;  %v626_v5 = vpop.f32.mrb[10].mxu1 }
 0x1da   :  { %v288_v6 = vmax.f32 %v626_v5, 1e-05  ;;  %v276_v7 = vpop.f32.mrb[11].mxu1  ;;  %v664_v8 = vpop.f32.mrb[10].mxu0 }
 0x1db   :  { %v287_v9 = vmax.f32 %v276_v7, 1e-05  ;;  %v502_v10 = vmax.f32 %v664_v8, 1e-05  ;;  %v490_v11 = vpop.f32.mrb[11].mxu0 }
 0x1dc   :  { %770 = vlog2.f32 %v288_v6  ;;  %v501_v12 = vmax.f32 %v490_v11, 1e-05 }
 0x1dd   :  { %772 = vlog2.f32 %v287_v9 }
 0x1de   :  { %v763_v13 = vpop.eup %762  ;;  %774 = vlog2.f32 %v502_v10 }
 0x1df   :  { %v765_v14 = vpop.eup %764  ;;  %776 = vlog2.f32 %v501_v12  ;;  %v292_v15 = vmul.f32 0.6931472, %v763_v13 }
 0x1e0   :  { %v290_v17 = vmul.f32 0.6931472, %v765_v14 }
 0x1e2   :  { %v767_v16 = vpop.eup %766 }
 0x1e3   :  { %v769_v18 = vpop.eup %768  ;;  %v506_v19 = vmul.f32 0.6931472, %v767_v16 }
 0x1e4   :  { %v504_v20 = vmul.f32 0.6931472, %v769_v18 }
 0x1e5   :  { %v512_v21 = vsub.f32 %v292_v15, %v506_v19 }
 0x1e6   :  { %v771_v22 = vpop.eup %770  ;;  %v511_v23 = vsub.f32 %v290_v17, %v504_v20 }
 0x1e7   :  { %v773_v24 = vpop.eup %772  ;;  %v516_v25 = vand.u32 2147483647, %v512_v21  ;;  %v296_v26 = vmul.f32 0.6931472, %v771_v22 }
 0x1e8   :  { %v775_v27 = vpop.eup %774  ;;  %v515_v28 = vand.u32 2147483647, %v511_v23  ;;  %v294_v29 = vmul.f32 0.6931472, %v773_v24 }
 0x1e9   :  { %v777_v30 = vpop.eup %776  ;;  %v510_v31 = vmul.f32 0.6931472, %v775_v27 }
 0x1ea   :  { %v519_v32 = vadd.f32 %v516_v25, %v515_v28  ;;  %v508_v33 = vmul.f32 0.6931472, %v777_v30 }
 0x1eb   :  { %v514_v34 = vsub.f32 %v296_v26, %v510_v31 }
 0x1ec   :  { %v513_v35 = vsub.f32 %v294_v29, %v508_v33 }
 0x1ed   :  { %v518_v37 = vand.u32 2147483647, %v514_v34 }
 0x1ee   :  { %v517_v36 = vand.u32 2147483647, %v513_v35 }
 0x1f0   :  { %v520_v38 = vadd.f32 %v519_v32, %v517_v36 }
 0x1f2   :  { %v521_v39 = vadd.f32 %v520_v38, %v518_v37 }
 0x1f4   :  { %v522_v40 = vrot.slane %v521_v39, 4 }
 0x1f6   :  { %v523_v41 = vadd.f32 %v522_v40, %v521_v39 }
 0x1f8   :  { %v524_v42 = vrot.slane %v523_v41, 2 }
 0x1fa   :  { %v525_v43 = vadd.f32 %v524_v42, %v523_v41 }
 0x1fc   :  { %v526_v44 = vrot.slane %v525_v43, 1 }
 0x1fe   :  { %v527_v45 = vadd.f32 %v526_v44, %v525_v43 }
 0x200   :  { %528 = vst [vmem:[%s931_s4] sm:$0x1] %v527_v45 }

</bundles_post_ra>
